<compile_context>
chip_gen: v6e
topology: v6e:2x2x1
jax: 0.10.0
libtpu: 0.0.40
codegen_flags: <defaults>
</compile_context>

<pallas_src>
import functools

import jax
import jax.numpy as jnp
from jax.experimental import pallas as pl
from jax.experimental.pallas import tpu as pltpu


def _round_up(x, m):
    return (x + m - 1) // m * m


def _sigmoid(z):
    # sigmoid(z) == 0.5 * tanh(z / 2) + 0.5  -> one EUP op instead of exp+recip.
    return 0.5 * jnp.tanh(0.5 * z) + 0.5


def _lstm_kernel(g_ref, wh_ref, out_ref, cfin_ref, h_sc, c_sc):
    tc = pl.program_id(1)          # time-chunk index (sequential axis)

    @pl.when(tc == 0)
    def _():
        h_sc[...] = jnp.zeros_like(h_sc)
        c_sc[...] = jnp.zeros_like(c_sc)

    Hp = h_sc.shape[-1]
    t_blk = g_ref.shape[0]

    h = h_sc[...]                  # (B_blk, Hp) f32 carry
    c = c_sc[...]

    for j in range(t_blk):         # static, unrolled inner loop over the chunk
        gates = g_ref[j].astype(jnp.float32) + jnp.dot(
            h.astype(wh_ref.dtype), wh_ref[...],
            preferred_element_type=jnp.float32)          # (B_blk, 4Hp)
        i_t = _sigmoid(gates[:, 0 * Hp:1 * Hp])
        f_t = _sigmoid(gates[:, 1 * Hp:2 * Hp])
        o_t = _sigmoid(gates[:, 2 * Hp:3 * Hp])
        c_hat = jnp.tanh(gates[:, 3 * Hp:4 * Hp])
        c = f_t * c + i_t * c_hat
        h = o_t * jnp.tanh(c)
        out_ref[j] = h.astype(out_ref.dtype)

    h_sc[...] = h
    c_sc[...] = c

    @pl.when(tc == pl.num_programs(1) - 1)
    def _():
        cfin_ref[...] = c.astype(cfin_ref.dtype)


@functools.partial(jax.jit, static_argnames=("t_blk_max", "matmul_dtype"))
def lstm_forward(x, w, b, *, t_blk_max=8, matmul_dtype=jnp.float32):
    """x: (B, T, D) f32; w: (4H, D+H); b: (4H,).

    Returns (output (B, T, H), (h_T (B, H), c_T (B, H))) matching the PyTorch
    module semantics.
    """
    B, T, D = x.shape
    fourH = w.shape[0]
    H = fourH // 4

    # --- alignment / tiling ---------------------------------------------
    Hp = _round_up(H, 128)                 # lane-aligned hidden size
    fourHp = 4 * Hp

    b_pad = _round_up(B, 8)                # sublane-aligned batch
    if b_pad > 128:
        b_blk = 128
        b_pad = _round_up(B, b_blk)
    else:
        b_blk = b_pad
    n_b = b_pad // b_blk

    # largest divisor of T that is <= t_blk_max (timesteps per grid step)
    t_blk = max(1, min(t_blk_max, T))
    while T % t_blk:
        t_blk -= 1
    n_t = T // t_blk

    # --- weights: split fused matrix, pad per-gate to Hp, pre-transpose ---
    wx = w[:, :D].reshape(4, H, D)
    wh = w[:, D:].reshape(4, H, H)
    bb = b.reshape(4, H)

    wx_p = jnp.pad(wx, ((0, 0), (0, Hp - H), (0, 0))).reshape(4 * Hp, D)
    wh_p = jnp.pad(wh, ((0, 0), (0, Hp - H), (0, Hp - H))).reshape(4 * Hp, Hp)
    b_p = jnp.pad(bb, ((0, 0), (0, Hp - H))).reshape(4 * Hp)

    wx_t = jnp.transpose(wx_p)                         # (D, 4Hp)
    wh_t = jnp.transpose(wh_p).astype(matmul_dtype)    # (Hp, 4Hp)

    x_p = jnp.pad(x, ((0, b_pad - B), (0, 0), (0, 0)))

    # --- hoisted input projection (+ bias), time-major, one big GEMM ------
    g = jnp.einsum('btd,dg->tbg', x_p, wx_t,
                   precision=jax.lax.Precision.HIGHEST) + b_p
    g = g.astype(matmul_dtype)                         # (T, b_pad, 4Hp)

    # --- VMEM budget (f32 upper bound) + headroom, capped at 64 MiB -------
    est = 4 * (2 * t_blk * b_blk * fourHp      # G blocks (double-buffered)
               + 2 * Hp * fourHp               # Wh^T (double-buffered, constant)
               + 2 * t_blk * b_blk * Hp        # output blocks
               + 3 * b_blk * Hp)               # c_fin resident + h/c scratch
    vmem_limit = int(min(max(2 * est, 32 * 1024 * 1024), 64 * 1024 * 1024))

    out_tbh, c_fin = pl.pallas_call(
        _lstm_kernel,
        out_shape=(
            jax.ShapeDtypeStruct((T, b_pad, Hp), x.dtype),
            jax.ShapeDtypeStruct((b_pad, Hp), x.dtype),
        ),
        grid_spec=pltpu.PrefetchScalarGridSpec(
            num_scalar_prefetch=0,
            grid=(n_b, n_t),                                  # (batch, time)
            in_specs=[
                pl.BlockSpec((t_blk, b_blk, fourHp), lambda bi, ti: (ti, bi, 0)),
                pl.BlockSpec((Hp, fourHp), lambda bi, ti: (0, 0)),   # Wh^T
            ],
            out_specs=[
                pl.BlockSpec((t_blk, b_blk, Hp), lambda bi, ti: (ti, bi, 0)),
                pl.BlockSpec((b_blk, Hp), lambda bi, ti: (bi, 0)),   # final c
            ],
            scratch_shapes=[
                pltpu.VMEM((b_blk, Hp), jnp.float32),   # h carry
                pltpu.VMEM((b_blk, Hp), jnp.float32),   # c carry
            ],
        ),
        compiler_params=pltpu.CompilerParams(
            dimension_semantics=("parallel", "arbitrary"),
            vmem_limit_bytes=vmem_limit,
        ),
    )(g, wh_t)

    output = jnp.transpose(out_tbh, (1, 0, 2))[:B, :, :H]   # (B, T, H)
    c_fin = c_fin[:B, :H]
    h_fin = output[:, -1, :]
    return output, (h_fin, c_fin)


def _lstm_reference(x, w, b):
    """Pure-JAX reference (matches the PyTorch module)."""
    B, T, D = x.shape
    H = w.shape[0] // 4

    def step(carry, x_t):
        h, c = carry
        xh = jnp.concatenate([x_t, h], axis=1)
        gates = jnp.dot(xh, w.T, precision=jax.lax.Precision.HIGHEST) + b
        i_t = jax.nn.sigmoid(gates[:, 0 * H:1 * H])
        f_t = jax.nn.sigmoid(gates[:, 1 * H:2 * H])
        o_t = jax.nn.sigmoid(gates[:, 2 * H:3 * H])
        c_hat = jnp.tanh(gates[:, 3 * H:4 * H])
        c_new = f_t * c + i_t * c_hat
        h_new = o_t * jnp.tanh(c_new)
        return (h_new, c_new), h_new

    h0 = jnp.zeros((B, H), x.dtype)
    c0 = jnp.zeros((B, H), x.dtype)
    (h_fin, c_fin), outs = jax.lax.scan(step, (h0, c0), jnp.transpose(x, (1, 0, 2)))
    return jnp.transpose(outs, (1, 0, 2)), (h_fin, c_fin)


if __name__ == "__main__":
    # small shapes: batch=2, seq=8, d_model=8, hidden=32
    B, T, D, H = 2, 8, 8, 32

    key = jax.random.PRNGKey(0)
    kx, kw, kb = jax.random.split(key, 3)

    x = jax.random.normal(kx, (B, T, D), dtype=jnp.float32)

    # deterministic parameter init (PyTorch Linear: U(-1/sqrt(fan_in), 1/sqrt(fan_in)))
    fan_in = D + H
    bound = 1.0 / jnp.sqrt(jnp.float32(fan_in))
    w = jax.random.uniform(kw, (4 * H, D + H), jnp.float32, -bound, bound)
    b = jax.random.uniform(kb, (4 * H,), jnp.float32, -bound, bound)

    # t_blk_max=4 -> two time chunks, exercising the cross-chunk h/c carry.
    out, (h_fin, c_fin) = lstm_forward(x, w, b, t_blk_max=4)
    jax.block_until_ready((out, h_fin, c_fin))

    out_ref, (h_ref, c_ref) = _lstm_reference(x, w, b)
    assert out.shape == (B, T, H) and h_fin.shape == (B, H) and c_fin.shape == (B, H)
    assert jnp.allclose(out, out_ref, atol=1e-4, rtol=1e-4)
    assert jnp.allclose(h_fin, h_ref, atol=1e-4, rtol=1e-4)
    assert jnp.allclose(c_fin, c_ref, atol=1e-4, rtol=1e-4)

    print("KERNEL_OK")
</pallas_src>

<mosaic_0001>
module attributes {stable_mosaic.version = 11 : i64} {
  func.func @_lstm_kernel(%arg0: i32, %arg1: i32, %arg2: memref<4x8x512xf32, #tpu.memory_space<vmem>>, %arg3: memref<128x512xf32, #tpu.memory_space<vmem>>, %arg4: memref<4x8x128xf32, #tpu.memory_space<vmem>>, %arg5: memref<8x128xf32, #tpu.memory_space<vmem>>, %arg6: memref<8x128xf32, #tpu.memory_space<vmem>>, %arg7: memref<8x128xf32, #tpu.memory_space<vmem>>) attributes {dimension_semantics = [#tpu.dimension_semantics<parallel>, #tpu.dimension_semantics<arbitrary>], iteration_bounds = array<i64: 1, 2>, scalar_prefetch = 0 : i64, scratch_operands = 2 : i64, tpu.core_type = #tpu.core_type<tc>, window_params = [{transform_indices = @transform_0, window_bounds = array<i64: 4, 8, 512>}, {pipeline_mode = #tpu.pipeline_mode<synchronous>, transform_indices = @transform_1, window_bounds = array<i64: 128, 512>}, {transform_indices = @transform_2, window_bounds = array<i64: 4, 8, 128>}, {transform_indices = @transform_3, window_bounds = array<i64: 8, 128>}]} {
    %c0_i32 = arith.constant 0 : i32
    %0 = arith.cmpi eq, %arg1, %c0_i32 : i32
    %1 = arith.extui %0 : i1 to i32
    %c0_i32_0 = arith.constant 0 : i32
    %2 = arith.cmpi ne, %1, %c0_i32_0 : i32
    scf.if %2 {
      %cst_77 = arith.constant 0.000000e+00 : f32
      %166 = vector.broadcast %cst_77 : f32 to vector<8x128xf32>
      %c0_78 = arith.constant 0 : index
      %c0_79 = arith.constant 0 : index
      %167 = vector.load %arg6[%c0_78, %c0_79] : memref<8x128xf32, #tpu.memory_space<vmem>>, vector<8x128xf32>
      tpu.vector_store %arg6[%c0_78, %c0_79], %166 {strides = array<i32>} : memref<8x128xf32, #tpu.memory_space<vmem>>, vector<8x128xf32>,
      %cst_80 = arith.constant 0.000000e+00 : f32
      %168 = vector.broadcast %cst_80 : f32 to vector<8x128xf32>
      %c0_81 = arith.constant 0 : index
      %c0_82 = arith.constant 0 : index
      %169 = vector.load %arg7[%c0_81, %c0_82] : memref<8x128xf32, #tpu.memory_space<vmem>>, vector<8x128xf32>
      tpu.vector_store %arg7[%c0_81, %c0_82], %168 {strides = array<i32>} : memref<8x128xf32, #tpu.memory_space<vmem>>, vector<8x128xf32>,
    } else {
    }
    %c0 = arith.constant 0 : index
    %c0_1 = arith.constant 0 : index
    %3 = vector.load %arg6[%c0, %c0_1] : memref<8x128xf32, #tpu.memory_space<vmem>>, vector<8x128xf32>
    %c0_2 = arith.constant 0 : index
    %c0_3 = arith.constant 0 : index
    %4 = vector.load %arg7[%c0_2, %c0_3] : memref<8x128xf32, #tpu.memory_space<vmem>>, vector<8x128xf32>
    %c0_4 = arith.constant 0 : index
    %c0_5 = arith.constant 0 : index
    %c0_6 = arith.constant 0 : index
    %5 = vector.load %arg2[%c0_4, %c0_5, %c0_6] : memref<4x8x512xf32, #tpu.memory_space<vmem>>, vector<1x8x512xf32>
    %6 = vector.shape_cast %5 : vector<1x8x512xf32> to vector<8x512xf32>
    %c0_7 = arith.constant 0 : index
    %c0_8 = arith.constant 0 : index
    %7 = vector.load %arg3[%c0_7, %c0_8] : memref<128x512xf32, #tpu.memory_space<vmem>>, vector<128x512xf32>
    %cst = arith.constant dense<0.000000e+00> : vector<8x512xf32>
    %8 = tpu.matmul %3, %7, %cst {dimension_numbers = #tpu.dot_dimension_numbers<[1], [0], [0], [1], [0, 0, 1, 1], [], []>} : vector<8x128xf32>, vector<128x512xf32>, vector<8x512xf32> -> vector<8x512xf32>
    %9 = arith.addf %6, %8 : vector<8x512xf32>
    %10 = vector.extract_strided_slice %9 {offsets = [0, 0], sizes = [8, 128], strides = [1, 1]} : vector<8x512xf32> to vector<8x128xf32>
    %cst_9 = arith.constant 5.000000e-01 : f32
    %11 = vector.broadcast %cst_9 : f32 to vector<8x128xf32>
    %12 = arith.mulf %11, %10 : vector<8x128xf32>
    %13 = math.tanh %12 : vector<8x128xf32>
    %cst_10 = arith.constant 5.000000e-01 : f32
    %14 = vector.broadcast %cst_10 : f32 to vector<8x128xf32>
    %15 = arith.mulf %14, %13 : vector<8x128xf32>
    %cst_11 = arith.constant 5.000000e-01 : f32
    %16 = vector.broadcast %cst_11 : f32 to vector<8x128xf32>
    %17 = arith.addf %15, %16 : vector<8x128xf32>
    %18 = vector.extract_strided_slice %9 {offsets = [0, 128], sizes = [8, 128], strides = [1, 1]} : vector<8x512xf32> to vector<8x128xf32>
    %cst_12 = arith.constant 5.000000e-01 : f32
    %19 = vector.broadcast %cst_12 : f32 to vector<8x128xf32>
    %20 = arith.mulf %19, %18 : vector<8x128xf32>
    %21 = math.tanh %20 : vector<8x128xf32>
    %cst_13 = arith.constant 5.000000e-01 : f32
    %22 = vector.broadcast %cst_13 : f32 to vector<8x128xf32>
    %23 = arith.mulf %22, %21 : vector<8x128xf32>
    %cst_14 = arith.constant 5.000000e-01 : f32
    %24 = vector.broadcast %cst_14 : f32 to vector<8x128xf32>
    %25 = arith.addf %23, %24 : vector<8x128xf32>
    %26 = vector.extract_strided_slice %9 {offsets = [0, 256], sizes = [8, 128], strides = [1, 1]} : vector<8x512xf32> to vector<8x128xf32>
    %cst_15 = arith.constant 5.000000e-01 : f32
    %27 = vector.broadcast %cst_15 : f32 to vector<8x128xf32>
    %28 = arith.mulf %27, %26 : vector<8x128xf32>
    %29 = math.tanh %28 : vector<8x128xf32>
    %cst_16 = arith.constant 5.000000e-01 : f32
    %30 = vector.broadcast %cst_16 : f32 to vector<8x128xf32>
    %31 = arith.mulf %30, %29 : vector<8x128xf32>
    %cst_17 = arith.constant 5.000000e-01 : f32
    %32 = vector.broadcast %cst_17 : f32 to vector<8x128xf32>
    %33 = arith.addf %31, %32 : vector<8x128xf32>
    %34 = vector.extract_strided_slice %9 {offsets = [0, 384], sizes = [8, 128], strides = [1, 1]} : vector<8x512xf32> to vector<8x128xf32>
    %35 = math.tanh %34 : vector<8x128xf32>
    %36 = arith.mulf %25, %4 : vector<8x128xf32>
    %37 = arith.mulf %17, %35 : vector<8x128xf32>
    %38 = arith.addf %36, %37 : vector<8x128xf32>
    %39 = math.tanh %38 : vector<8x128xf32>
    %40 = arith.mulf %33, %39 : vector<8x128xf32>
    %c0_18 = arith.constant 0 : index
    %c0_19 = arith.constant 0 : index
    %c0_20 = arith.constant 0 : index
    %41 = vector.load %arg4[%c0_18, %c0_19, %c0_20] : memref<4x8x128xf32, #tpu.memory_space<vmem>>, vector<1x8x128xf32>
    %42 = vector.shape_cast %41 : vector<1x8x128xf32> to vector<8x128xf32>
    %43 = vector.shape_cast %40 : vector<8x128xf32> to vector<1x8x128xf32>
    tpu.vector_store %arg4[%c0_18, %c0_19, %c0_20], %43 {strides = array<i32>} : memref<4x8x128xf32, #tpu.memory_space<vmem>>, vector<1x8x128xf32>,
    %c1 = arith.constant 1 : index
    %c0_21 = arith.constant 0 : index
    %c0_22 = arith.constant 0 : index
    %44 = vector.load %arg2[%c1, %c0_21, %c0_22] : memref<4x8x512xf32, #tpu.memory_space<vmem>>, vector<1x8x512xf32>
    %45 = vector.shape_cast %44 : vector<1x8x512xf32> to vector<8x512xf32>
    %c0_23 = arith.constant 0 : index
    %c0_24 = arith.constant 0 : index
    %46 = vector.load %arg3[%c0_23, %c0_24] : memref<128x512xf32, #tpu.memory_space<vmem>>, vector<128x512xf32>
    %cst_25 = arith.constant dense<0.000000e+00> : vector<8x512xf32>
    %47 = tpu.matmul %40, %46, %cst_25 {dimension_numbers = #tpu.dot_dimension_numbers<[1], [0], [0], [1], [0, 0, 1, 1], [], []>} : vector<8x128xf32>, vector<128x512xf32>, vector<8x512xf32> -> vector<8x512xf32>
    %48 = arith.addf %45, %47 : vector<8x512xf32>
    %49 = vector.extract_strided_slice %48 {offsets = [0, 0], sizes = [8, 128], strides = [1, 1]} : vector<8x512xf32> to vector<8x128xf32>
    %cst_26 = arith.constant 5.000000e-01 : f32
    %50 = vector.broadcast %cst_26 : f32 to vector<8x128xf32>
    %51 = arith.mulf %50, %49 : vector<8x128xf32>
    %52 = math.tanh %51 : vector<8x128xf32>
    %cst_27 = arith.constant 5.000000e-01 : f32
    %53 = vector.broadcast %cst_27 : f32 to vector<8x128xf32>
    %54 = arith.mulf %53, %52 : vector<8x128xf32>
    %cst_28 = arith.constant 5.000000e-01 : f32
    %55 = vector.broadcast %cst_28 : f32 to vector<8x128xf32>
    %56 = arith.addf %54, %55 : vector<8x128xf32>
    %57 = vector.extract_strided_slice %48 {offsets = [0, 128], sizes = [8, 128], strides = [1, 1]} : vector<8x512xf32> to vector<8x128xf32>
    %cst_29 = arith.constant 5.000000e-01 : f32
    %58 = vector.broadcast %cst_29 : f32 to vector<8x128xf32>
    %59 = arith.mulf %58, %57 : vector<8x128xf32>
    %60 = math.tanh %59 : vector<8x128xf32>
    %cst_30 = arith.constant 5.000000e-01 : f32
    %61 = vector.broadcast %cst_30 : f32 to vector<8x128xf32>
    %62 = arith.mulf %61, %60 : vector<8x128xf32>
    %cst_31 = arith.constant 5.000000e-01 : f32
    %63 = vector.broadcast %cst_31 : f32 to vector<8x128xf32>
    %64 = arith.addf %62, %63 : vector<8x128xf32>
    %65 = vector.extract_strided_slice %48 {offsets = [0, 256], sizes = [8, 128], strides = [1, 1]} : vector<8x512xf32> to vector<8x128xf32>
    %cst_32 = arith.constant 5.000000e-01 : f32
    %66 = vector.broadcast %cst_32 : f32 to vector<8x128xf32>
    %67 = arith.mulf %66, %65 : vector<8x128xf32>
    %68 = math.tanh %67 : vector<8x128xf32>
    %cst_33 = arith.constant 5.000000e-01 : f32
    %69 = vector.broadcast %cst_33 : f32 to vector<8x128xf32>
    %70 = arith.mulf %69, %68 : vector<8x128xf32>
    %cst_34 = arith.constant 5.000000e-01 : f32
    %71 = vector.broadcast %cst_34 : f32 to vector<8x128xf32>
    %72 = arith.addf %70, %71 : vector<8x128xf32>
    %73 = vector.extract_strided_slice %48 {offsets = [0, 384], sizes = [8, 128], strides = [1, 1]} : vector<8x512xf32> to vector<8x128xf32>
    %74 = math.tanh %73 : vector<8x128xf32>
    %75 = arith.mulf %64, %38 : vector<8x128xf32>
    %76 = arith.mulf %56, %74 : vector<8x128xf32>
    %77 = arith.addf %75, %76 : vector<8x128xf32>
    %78 = math.tanh %77 : vector<8x128xf32>
    %79 = arith.mulf %72, %78 : vector<8x128xf32>
    %c1_35 = arith.constant 1 : index
    %c0_36 = arith.constant 0 : index
    %c0_37 = arith.constant 0 : index
    %80 = vector.load %arg4[%c1_35, %c0_36, %c0_37] : memref<4x8x128xf32, #tpu.memory_space<vmem>>, vector<1x8x128xf32>
    %81 = vector.shape_cast %80 : vector<1x8x128xf32> to vector<8x128xf32>
    %82 = vector.shape_cast %79 : vector<8x128xf32> to vector<1x8x128xf32>
    tpu.vector_store %arg4[%c1_35, %c0_36, %c0_37], %82 {strides = array<i32>} : memref<4x8x128xf32, #tpu.memory_space<vmem>>, vector<1x8x128xf32>,
    %c2 = arith.constant 2 : index
    %c0_38 = arith.constant 0 : index
    %c0_39 = arith.constant 0 : index
    %83 = vector.load %arg2[%c2, %c0_38, %c0_39] : memref<4x8x512xf32, #tpu.memory_space<vmem>>, vector<1x8x512xf32>
    %84 = vector.shape_cast %83 : vector<1x8x512xf32> to vector<8x512xf32>
    %c0_40 = arith.constant 0 : index
    %c0_41 = arith.constant 0 : index
    %85 = vector.load %arg3[%c0_40, %c0_41] : memref<128x512xf32, #tpu.memory_space<vmem>>, vector<128x512xf32>
    %cst_42 = arith.constant dense<0.000000e+00> : vector<8x512xf32>
    %86 = tpu.matmul %79, %85, %cst_42 {dimension_numbers = #tpu.dot_dimension_numbers<[1], [0], [0], [1], [0, 0, 1, 1], [], []>} : vector<8x128xf32>, vector<128x512xf32>, vector<8x512xf32> -> vector<8x512xf32>
    %87 = arith.addf %84, %86 : vector<8x512xf32>
    %88 = vector.extract_strided_slice %87 {offsets = [0, 0], sizes = [8, 128], strides = [1, 1]} : vector<8x512xf32> to vector<8x128xf32>
    %cst_43 = arith.constant 5.000000e-01 : f32
    %89 = vector.broadcast %cst_43 : f32 to vector<8x128xf32>
    %90 = arith.mulf %89, %88 : vector<8x128xf32>
    %91 = math.tanh %90 : vector<8x128xf32>
    %cst_44 = arith.constant 5.000000e-01 : f32
    %92 = vector.broadcast %cst_44 : f32 to vector<8x128xf32>
    %93 = arith.mulf %92, %91 : vector<8x128xf32>
    %cst_45 = arith.constant 5.000000e-01 : f32
    %94 = vector.broadcast %cst_45 : f32 to vector<8x128xf32>
    %95 = arith.addf %93, %94 : vector<8x128xf32>
    %96 = vector.extract_strided_slice %87 {offsets = [0, 128], sizes = [8, 128], strides = [1, 1]} : vector<8x512xf32> to vector<8x128xf32>
    %cst_46 = arith.constant 5.000000e-01 : f32
    %97 = vector.broadcast %cst_46 : f32 to vector<8x128xf32>
    %98 = arith.mulf %97, %96 : vector<8x128xf32>
    %99 = math.tanh %98 : vector<8x128xf32>
    %cst_47 = arith.constant 5.000000e-01 : f32
    %100 = vector.broadcast %cst_47 : f32 to vector<8x128xf32>
    %101 = arith.mulf %100, %99 : vector<8x128xf32>
    %cst_48 = arith.constant 5.000000e-01 : f32
    %102 = vector.broadcast %cst_48 : f32 to vector<8x128xf32>
    %103 = arith.addf %101, %102 : vector<8x128xf32>
    %104 = vector.extract_strided_slice %87 {offsets = [0, 256], sizes = [8, 128], strides = [1, 1]} : vector<8x512xf32> to vector<8x128xf32>
    %cst_49 = arith.constant 5.000000e-01 : f32
    %105 = vector.broadcast %cst_49 : f32 to vector<8x128xf32>
    %106 = arith.mulf %105, %104 : vector<8x128xf32>
    %107 = math.tanh %106 : vector<8x128xf32>
    %cst_50 = arith.constant 5.000000e-01 : f32
    %108 = vector.broadcast %cst_50 : f32 to vector<8x128xf32>
    %109 = arith.mulf %108, %107 : vector<8x128xf32>
    %cst_51 = arith.constant 5.000000e-01 : f32
    %110 = vector.broadcast %cst_51 : f32 to vector<8x128xf32>
    %111 = arith.addf %109, %110 : vector<8x128xf32>
    %112 = vector.extract_strided_slice %87 {offsets = [0, 384], sizes = [8, 128], strides = [1, 1]} : vector<8x512xf32> to vector<8x128xf32>
    %113 = math.tanh %112 : vector<8x128xf32>
    %114 = arith.mulf %103, %77 : vector<8x128xf32>
    %115 = arith.mulf %95, %113 : vector<8x128xf32>
    %116 = arith.addf %114, %115 : vector<8x128xf32>
    %117 = math.tanh %116 : vector<8x128xf32>
    %118 = arith.mulf %111, %117 : vector<8x128xf32>
    %c2_52 = arith.constant 2 : index
    %c0_53 = arith.constant 0 : index
    %c0_54 = arith.constant 0 : index
    %119 = vector.load %arg4[%c2_52, %c0_53, %c0_54] : memref<4x8x128xf32, #tpu.memory_space<vmem>>, vector<1x8x128xf32>
    %120 = vector.shape_cast %119 : vector<1x8x128xf32> to vector<8x128xf32>
    %121 = vector.shape_cast %118 : vector<8x128xf32> to vector<1x8x128xf32>
    tpu.vector_store %arg4[%c2_52, %c0_53, %c0_54], %121 {strides = array<i32>} : memref<4x8x128xf32, #tpu.memory_space<vmem>>, vector<1x8x128xf32>,
    %c3 = arith.constant 3 : index
    %c0_55 = arith.constant 0 : index
    %c0_56 = arith.constant 0 : index
    %122 = vector.load %arg2[%c3, %c0_55, %c0_56] : memref<4x8x512xf32, #tpu.memory_space<vmem>>, vector<1x8x512xf32>
    %123 = vector.shape_cast %122 : vector<1x8x512xf32> to vector<8x512xf32>
    %c0_57 = arith.constant 0 : index
    %c0_58 = arith.constant 0 : index
    %124 = vector.load %arg3[%c0_57, %c0_58] : memref<128x512xf32, #tpu.memory_space<vmem>>, vector<128x512xf32>
    %cst_59 = arith.constant dense<0.000000e+00> : vector<8x512xf32>
    %125 = tpu.matmul %118, %124, %cst_59 {dimension_numbers = #tpu.dot_dimension_numbers<[1], [0], [0], [1], [0, 0, 1, 1], [], []>} : vector<8x128xf32>, vector<128x512xf32>, vector<8x512xf32> -> vector<8x512xf32>
    %126 = arith.addf %123, %125 : vector<8x512xf32>
    %127 = vector.extract_strided_slice %126 {offsets = [0, 0], sizes = [8, 128], strides = [1, 1]} : vector<8x512xf32> to vector<8x128xf32>
    %cst_60 = arith.constant 5.000000e-01 : f32
    %128 = vector.broadcast %cst_60 : f32 to vector<8x128xf32>
    %129 = arith.mulf %128, %127 : vector<8x128xf32>
    %130 = math.tanh %129 : vector<8x128xf32>
    %cst_61 = arith.constant 5.000000e-01 : f32
    %131 = vector.broadcast %cst_61 : f32 to vector<8x128xf32>
    %132 = arith.mulf %131, %130 : vector<8x128xf32>
    %cst_62 = arith.constant 5.000000e-01 : f32
    %133 = vector.broadcast %cst_62 : f32 to vector<8x128xf32>
    %134 = arith.addf %132, %133 : vector<8x128xf32>
    %135 = vector.extract_strided_slice %126 {offsets = [0, 128], sizes = [8, 128], strides = [1, 1]} : vector<8x512xf32> to vector<8x128xf32>
    %cst_63 = arith.constant 5.000000e-01 : f32
    %136 = vector.broadcast %cst_63 : f32 to vector<8x128xf32>
    %137 = arith.mulf %136, %135 : vector<8x128xf32>
    %138 = math.tanh %137 : vector<8x128xf32>
    %cst_64 = arith.constant 5.000000e-01 : f32
    %139 = vector.broadcast %cst_64 : f32 to vector<8x128xf32>
    %140 = arith.mulf %139, %138 : vector<8x128xf32>
    %cst_65 = arith.constant 5.000000e-01 : f32
    %141 = vector.broadcast %cst_65 : f32 to vector<8x128xf32>
    %142 = arith.addf %140, %141 : vector<8x128xf32>
    %143 = vector.extract_strided_slice %126 {offsets = [0, 256], sizes = [8, 128], strides = [1, 1]} : vector<8x512xf32> to vector<8x128xf32>
    %cst_66 = arith.constant 5.000000e-01 : f32
    %144 = vector.broadcast %cst_66 : f32 to vector<8x128xf32>
    %145 = arith.mulf %144, %143 : vector<8x128xf32>
    %146 = math.tanh %145 : vector<8x128xf32>
    %cst_67 = arith.constant 5.000000e-01 : f32
    %147 = vector.broadcast %cst_67 : f32 to vector<8x128xf32>
    %148 = arith.mulf %147, %146 : vector<8x128xf32>
    %cst_68 = arith.constant 5.000000e-01 : f32
    %149 = vector.broadcast %cst_68 : f32 to vector<8x128xf32>
    %150 = arith.addf %148, %149 : vector<8x128xf32>
    %151 = vector.extract_strided_slice %126 {offsets = [0, 384], sizes = [8, 128], strides = [1, 1]} : vector<8x512xf32> to vector<8x128xf32>
    %152 = math.tanh %151 : vector<8x128xf32>
    %153 = arith.mulf %142, %116 : vector<8x128xf32>
    %154 = arith.mulf %134, %152 : vector<8x128xf32>
    %155 = arith.addf %153, %154 : vector<8x128xf32>
    %156 = math.tanh %155 : vector<8x128xf32>
    %157 = arith.mulf %150, %156 : vector<8x128xf32>
    %c3_69 = arith.constant 3 : index
    %c0_70 = arith.constant 0 : index
    %c0_71 = arith.constant 0 : index
    %158 = vector.load %arg4[%c3_69, %c0_70, %c0_71] : memref<4x8x128xf32, #tpu.memory_space<vmem>>, vector<1x8x128xf32>
    %159 = vector.shape_cast %158 : vector<1x8x128xf32> to vector<8x128xf32>
    %160 = vector.shape_cast %157 : vector<8x128xf32> to vector<1x8x128xf32>
    tpu.vector_store %arg4[%c3_69, %c0_70, %c0_71], %160 {strides = array<i32>} : memref<4x8x128xf32, #tpu.memory_space<vmem>>, vector<1x8x128xf32>,
    %c0_72 = arith.constant 0 : index
    %c0_73 = arith.constant 0 : index
    %161 = vector.load %arg6[%c0_72, %c0_73] : memref<8x128xf32, #tpu.memory_space<vmem>>, vector<8x128xf32>
    tpu.vector_store %arg6[%c0_72, %c0_73], %157 {strides = array<i32>} : memref<8x128xf32, #tpu.memory_space<vmem>>, vector<8x128xf32>,
    %c0_74 = arith.constant 0 : index
    %c0_75 = arith.constant 0 : index
    %162 = vector.load %arg7[%c0_74, %c0_75] : memref<8x128xf32, #tpu.memory_space<vmem>>, vector<8x128xf32>
    tpu.vector_store %arg7[%c0_74, %c0_75], %155 {strides = array<i32>} : memref<8x128xf32, #tpu.memory_space<vmem>>, vector<8x128xf32>,
    %c1_i32 = arith.constant 1 : i32
    %163 = arith.cmpi eq, %arg1, %c1_i32 : i32
    %164 = arith.extui %163 : i1 to i32
    %c0_i32_76 = arith.constant 0 : i32
    %165 = arith.cmpi ne, %164, %c0_i32_76 : i32
    scf.if %165 {
      %c0_77 = arith.constant 0 : index
      %c0_78 = arith.constant 0 : index
      %166 = vector.load %arg5[%c0_77, %c0_78] : memref<8x128xf32, #tpu.memory_space<vmem>>, vector<8x128xf32>
      tpu.vector_store %arg5[%c0_77, %c0_78], %155 {strides = array<i32>} : memref<8x128xf32, #tpu.memory_space<vmem>>, vector<8x128xf32>,
    } else {
    }
    return
  }
  func.func @transform_0(%arg0: i32, %arg1: i32) -> (i32, i32, i32) {
    %c0_i32 = arith.constant 0 : i32
    %c0_i32_0 = arith.constant 0 : i32
    return %arg1, %arg0, %c0_i32 : i32, i32, i32
  }
  func.func @transform_1(%arg0: i32, %arg1: i32) -> (i32, i32) {
    %c0_i32 = arith.constant 0 : i32
    %c0_i32_0 = arith.constant 0 : i32
    %c0_i32_1 = arith.constant 0 : i32
    return %c0_i32, %c0_i32_0 : i32, i32
  }
  func.func @transform_2(%arg0: i32, %arg1: i32) -> (i32, i32, i32) {
    %c0_i32 = arith.constant 0 : i32
    %c0_i32_0 = arith.constant 0 : i32
    return %arg1, %arg0, %c0_i32 : i32, i32, i32
  }
  func.func @transform_3(%arg0: i32, %arg1: i32) -> (i32, i32) {
    %c0_i32 = arith.constant 0 : i32
    %c0_i32_0 = arith.constant 0 : i32
    return %arg0, %c0_i32 : i32, i32
  }
}

</mosaic_0001>

<bundles_post_ra>
// kernel: lstm_forward.1
= control target key start
LH: loop header
LB: loop body
LE: loop exit
PB: predicated region body
PF: predicated region fallthrough
CT: control target
= control target key end

     0   :  { %s1430_s12 = smov 0   ;;  %s1432_s13 = smov 0   ;;  %s2087_s0 = inlined_call_operand.vmem [shape: f32[8,8,512], index: 0, kind: input, shape index: {}]   ;;  %s2088_s1 = inlined_call_operand.vmem [shape: f32[128,512], index: 1, kind: input, shape index: {}]   ;;  %s2089_s2 = inlined_call_operand.vmem [shape: f32[8,8,128], index: 2, kind: output, shape index: {0}]   ;;  %s2090_s3 = inlined_call_operand.vmem [shape: f32[8,128], index: 3, kind: output, shape index: {1}]  }
   0x1   :  { %s1434_s14 = smov 0  }
   0x2 LB: > { %s23_s15 = sadd.s32 1, %s1402_s13  ;;  %p1291_p0 = scmp.ge.s32.totalorder %s1406_s14, 1  ;;  %s1406_s14 = sphi %s1434_s14, %s14_s14   ;;  %s1402_s13 = sphi %s1432_s13, %s2197_s13   ;;  %s1398_s12 = sphi %s1430_s12, %s2196_s12  }
   0x3   : > { %p24_p1 = scmp.ge.s32.totalorder %s23_s15, 2  ;;  %p162_p2 = scmp.lt.s32.totalorder %s1406_s14, 3 }
   0x5   : > { %s2199_s15 = smov (%p24_p1, %s23_s15), 0  ;;  %p163_p3 = pnand %p1291_p0, %p162_p2 }
   0x7   : > { %166 = sbr.rel (%p163_p3) target bundleno = 1004 (0x3ec), region = 28 }
   0xc   : > { %s1292_s16 = sshll.u32 %s1398_s12, 2  ;;  %p1297_p5 = scmp.ne.s32.totalorder %s1398_s12, 0 }
   0xd   : > { %p199_p4 = scmp.lt.s32.totalorder %s1292_s16, 7 }
   0xe   : > { %225 = sbr.rel (%p1297_p5) target bundleno = 21 (0x15), region = 32 }
   0xf   : > { %s2201_s16 = smov (!%p199_p4, %s1292_s16), 7 }
  0x10   : > { %s1317_s17 = sshll.u32 %s2201_s16, 5  ;;  %s1296_s18 = sshll.u32 %s2201_s16, 3 }
  0x11   : > { %s1454_s21 = scalar_lea.vmem %s2087_s0, %s1317_s17  ;;  %s1459_s24 = scalar_lea.vmem %s2089_s2, %s1296_s18 }
  0x13   : > { %v1408_v0 = vmov 0.0  }
  0x14   : > { %226 = vst [vmem:[#allocation2] sm:$0xff] %v1408_v0  ;;  %227 = vst [vmem:[#allocation3] sm:$0xff] %v1408_v0 }
  0x15 PF: > { %v1465_v1 = vld [vmem:[%s2088_s1 + $0x1e8] sm:$0xff]  ;;  %v1470_v2 = vld [vmem:[%s2088_s1 + $0x1e0] sm:$0xff]  ;;  %v1486_v5 = vld [vmem:[%s2088_s1 + $0x1f8] sm:$0xff]  ;;  %v2091_v6 = vmov 0.0   ;;  %p1313_p6 = scmp.ne.s32.totalorder %s1398_s12, 1 }
  0x16   : > { %2133 = vst [vmem:[#allocation4_spill] sm:$0xff] %v1465_v1  ;;  %v1475_v3 = vld [vmem:[%s2088_s1 + $0x1c8] sm:$0xff]  ;;  %298 = vmatprep.subr.mxu0 %v1465_v1  ;;  %v1481_v4 = vld [vmem:[%s2088_s1 + $0x1c0] sm:$0xff]  ;;  %2134 = vst [vmem:[#allocation5_spill] sm:$0xff] %v1486_v5  ;;  %362 = vmatprep.mubr.f32.mxu0 %v2091_v6 }
  0x17   : > { %299 = vmatpush1.msra.mxu0 %v1470_v2  ;;  %v1493_v7 = vld [vmem:[%s2088_s1 + $0x1a8] sm:$0xff]  ;;  %369 = vmatprep.subr.mxu1 %v1486_v5  ;;  %v1499_v8 = vld [vmem:[%s2088_s1 + $0x1f0] sm:$0xff]  ;;  %v1505_v9 = vld [vmem:[%s2088_s1 + $0x1a0] sm:$0xff] }
  0x18   : > { %300 = vmatprep.subr.mxu0 %v1475_v3  ;;  %370 = vmatpush1.msra.mxu1 %v1499_v8  ;;  %v1511_v10 = vld [vmem:[%s2088_s1 + $0x1d8] sm:$0xff]  ;;  %v1516_v11 = vld [vmem:[%s2088_s1 + $0x1d0] sm:$0xff]  ;;  %v1522_v12 = vld [vmem:[%s2088_s1 + $0x188] sm:$0xff] }
  0x19   : > { %301 = vmatpush1.msra.mxu0 %v1481_v4  ;;  %371 = vmatprep.subr.mxu1 %v1511_v10  ;;  %v1528_v13 = vld [vmem:[%s2088_s1 + $0x1b8] sm:$0xff]  ;;  %v1534_v14 = vld [vmem:[%s2088_s1 + $0x180] sm:$0xff]  ;;  %v1540_v15 = vld [vmem:[%s2088_s1 + $0x1b0] sm:$0xff] }
  0x1a   : > { %302 = vmatprep.subr.mxu0 %v1493_v7  ;;  %372 = vmatpush1.msra.mxu1 %v1516_v11  ;;  %v1545_v16 = vld [vmem:[%s2088_s1 + $0x198] sm:$0xff]  ;;  %v1551_v17 = vld [vmem:[%s2088_s1 + $0x168] sm:$0xff]  ;;  %v1557_v18 = vld [vmem:[%s2088_s1 + $0x190] sm:$0xff] }
  0x1b   : > { %303 = vmatpush1.msra.mxu0 %v1505_v9  ;;  %373 = vmatprep.subr.mxu1 %v1528_v13  ;;  %v1563_v19 = vld [vmem:[%s2088_s1 + $0x160] sm:$0xff]  ;;  %v1569_v20 = vld [vmem:[%s2088_s1 + $0x178] sm:$0xff]  ;;  %v1575_v21 = vld [vmem:[%s2088_s1 + $0x148] sm:$0xff] }
  0x1c   : > { %304 = vmatprep.subr.mxu0 %v1522_v12  ;;  %374 = vmatpush1.msra.mxu1 %v1540_v15  ;;  %v1581_v22 = vld [vmem:[%s2088_s1 + $0x170] sm:$0xff]  ;;  %v1587_v23 = vld [vmem:[%s2088_s1 + $0x140] sm:$0xff]  ;;  %v1593_v24 = vld [vmem:[%s2088_s1 + $0x158] sm:$0xff] }
  0x1d   : > { %305 = vmatpush1.msra.mxu0 %v1534_v14  ;;  %375 = vmatprep.subr.mxu1 %v1545_v16  ;;  %v1599_v25 = vld [vmem:[%s2088_s1 + $0x128] sm:$0xff]  ;;  %v1605_v26 = vld [vmem:[%s2088_s1 + $0x150] sm:$0xff]  ;;  %v1611_v27 = vld [vmem:[%s2088_s1 + $0x120] sm:$0xff] }
  0x1e   : > { %306 = vmatprep.subr.mxu0 %v1551_v17  ;;  %376 = vmatpush1.msra.mxu1 %v1557_v18  ;;  %v1617_v28 = vld [vmem:[%s2088_s1 + $0x138] sm:$0xff]  ;;  %v1623_v29 = vld [vmem:[%s2088_s1 + $0x108] sm:$0xff]  ;;  %v1629_v30 = vld [vmem:[%s2088_s1 + $0x130] sm:$0xff] }
  0x1f   : > { %307 = vmatpush1.msra.mxu0 %v1563_v19  ;;  %377 = vmatprep.subr.mxu1 %v1569_v20  ;;  %v1635_v31 = vld [vmem:[%s2088_s1 + $0x100] sm:$0xff]  ;;  %v1641_v32 = vld [vmem:[%s2088_s1 + $0x118] sm:$0xff]  ;;  %v1647_v33 = vld [vmem:[%s2088_s1 + $0xe8] sm:$0xff] }
  0x20   : > { %308 = vmatprep.subr.mxu0 %v1575_v21  ;;  %378 = vmatpush1.msra.mxu1 %v1581_v22  ;;  %v1653_v34 = vld [vmem:[%s2088_s1 + $0x110] sm:$0xff]  ;;  %v1659_v35 = vld [vmem:[%s2088_s1 + $0xe0] sm:$0xff]  ;;  %v1665_v36 = vld [vmem:[%s2088_s1 + $0xf8] sm:$0xff] }
  0x21   : > { %309 = vmatpush1.msra.mxu0 %v1587_v23  ;;  %379 = vmatprep.subr.mxu1 %v1593_v24  ;;  %v1671_v37 = vld [vmem:[%s2088_s1 + $0xc8] sm:$0xff]  ;;  %v1677_v38 = vld [vmem:[%s2088_s1 + $0xf0] sm:$0xff]  ;;  %v1683_v39 = vld [vmem:[%s2088_s1 + $0xc0] sm:$0xff] }
  0x22   : > { %310 = vmatprep.subr.mxu0 %v1599_v25  ;;  %380 = vmatpush1.msra.mxu1 %v1605_v26  ;;  %v1689_v40 = vld [vmem:[%s2088_s1 + $0xd8] sm:$0xff]  ;;  %v1695_v41 = vld [vmem:[%s2088_s1 + $0xa8] sm:$0xff]  ;;  %v1701_v42 = vld [vmem:[%s2088_s1 + $0xd0] sm:$0xff] }
  0x23   : > { %311 = vmatpush1.msra.mxu0 %v1611_v27  ;;  %381 = vmatprep.subr.mxu1 %v1617_v28  ;;  %v1707_v43 = vld [vmem:[%s2088_s1 + $0xa0] sm:$0xff]  ;;  %v1713_v44 = vld [vmem:[%s2088_s1 + $0xb8] sm:$0xff]  ;;  %v1719_v45 = vld [vmem:[%s2088_s1 + $0x88] sm:$0xff] }
  0x24   : > { %312 = vmatprep.subr.mxu0 %v1623_v29  ;;  %382 = vmatpush1.msra.mxu1 %v1629_v30  ;;  %v1725_v46 = vld [vmem:[%s2088_s1 + $0xb0] sm:$0xff]  ;;  %v1731_v47 = vld [vmem:[%s2088_s1 + $0x80] sm:$0xff]  ;;  %v1737_v48 = vld [vmem:[%s2088_s1 + $0x98] sm:$0xff] }
  0x25   : > { %313 = vmatpush1.msra.mxu0 %v1635_v31  ;;  %383 = vmatprep.subr.mxu1 %v1641_v32  ;;  %2135 = vst [vmem:[#allocation6_spill] sm:$0xff] %v1731_v47  ;;  %v1743_v49 = vld [vmem:[%s2088_s1 + $0x68] sm:$0xff]  ;;  %v1749_v50 = vld [vmem:[%s2088_s1 + $0x90] sm:$0xff]  ;;  %v1755_v51 = vld [vmem:[%s2088_s1 + $0x60] sm:$0xff] }
  0x26   : > { %314 = vmatprep.subr.mxu0 %v1647_v33  ;;  %384 = vmatpush1.msra.mxu1 %v1653_v34  ;;  %2136 = vst [vmem:[#allocation7_spill] sm:$0xff] %v1743_v49  ;;  %2137 = vst [vmem:[#allocation8_spill] sm:$0xff] %v1749_v50  ;;  %v1761_v52 = vld [vmem:[%s2088_s1 + $0x78] sm:$0xff]  ;;  %v1767_v53 = vld [vmem:[%s2088_s1 + $0x48] sm:$0xff] }
  0x27   : > { %315 = vmatpush1.msra.mxu0 %v1659_v35  ;;  %385 = vmatprep.subr.mxu1 %v1665_v36  ;;  %2138 = vst [vmem:[#allocation9_spill] sm:$0xff] %v1755_v51  ;;  %2139 = vst [vmem:[#allocation10_spill] sm:$0xff] %v1761_v52  ;;  %v1773_v54 = vld [vmem:[%s2088_s1 + $0x70] sm:$0xff]  ;;  %v1779_v55 = vld [vmem:[%s2088_s1 + $0x40] sm:$0xff] }
  0x28   : > { %316 = vmatprep.subr.mxu0 %v1671_v37  ;;  %386 = vmatpush1.msra.mxu1 %v1677_v38  ;;  %2140 = vst [vmem:[#allocation11_spill] sm:$0xff] %v1767_v53  ;;  %2141 = vst [vmem:[#allocation12_spill] sm:$0xff] %v1773_v54  ;;  %v1785_v56 = vld [vmem:[%s2088_s1 + $0x58] sm:$0xff]  ;;  %v1791_v57 = vld [vmem:[%s2088_s1 + $0x28] sm:$0xff] }
  0x29   : > { %317 = vmatpush1.msra.mxu0 %v1683_v39  ;;  %387 = vmatprep.subr.mxu1 %v1689_v40  ;;  %2142 = vst [vmem:[#allocation13_spill] sm:$0xff] %v1779_v55  ;;  %2143 = vst [vmem:[#allocation14_spill] sm:$0xff] %v1785_v56  ;;  %v1797_v58 = vld [vmem:[%s2088_s1 + $0x50] sm:$0xff]  ;;  %v1803_v59 = vld [vmem:[%s2088_s1 + $0x20] sm:$0xff] }
  0x2a   : > { %318 = vmatprep.subr.mxu0 %v1695_v41  ;;  %388 = vmatpush1.msra.mxu1 %v1701_v42  ;;  %2144 = vst [vmem:[#allocation15_spill] sm:$0xff] %v1791_v57  ;;  %2145 = vst [vmem:[#allocation16_spill] sm:$0xff] %v1797_v58  ;;  %v1809_v60 = vld [vmem:[%s2088_s1 + $0x38] sm:$0xff]  ;;  %v1815_v61 = vld [vmem:[%s2088_s1 + $0x8] sm:$0xff] }
  0x2b   : > { %319 = vmatpush1.msra.mxu0 %v1707_v43  ;;  %389 = vmatprep.subr.mxu1 %v1713_v44  ;;  %2146 = vst [vmem:[#allocation17_spill] sm:$0xff] %v1803_v59  ;;  %2147 = vst [vmem:[#allocation18_spill] sm:$0xff] %v1809_v60  ;;  %v1821_v62 = vld [vmem:[%s2088_s1 + $0x30] sm:$0xff]  ;;  %v1827_v63 = vld [vmem:[%s2088_s1] sm:$0xff] }
  0x2c   : > { %320 = vmatprep.subr.mxu0 %v1719_v45  ;;  %390 = vmatpush1.msra.mxu1 %v1725_v46  ;;  %2148 = vst [vmem:[#allocation19_spill] sm:$0xff] %v1815_v61  ;;  %2149 = vst [vmem:[#allocation20_spill] sm:$0xff] %v1821_v62  ;;  %v1833_v0 = vld [vmem:[%s2088_s1 + $0x18] sm:$0xff]  ;;  %v228_v6 = vld [vmem:[#allocation2] sm:$0xff] }
  0x2d   : > { %321 = vmatpush1.msra.mxu0 %v1731_v47  ;;  %391 = vmatprep.subr.mxu1 %v1737_v48  ;;  %2150 = vst [vmem:[#allocation21_spill] sm:$0xff] %v1827_v63  ;;  %2151 = vst [vmem:[#allocation22_spill] sm:$0xff] %v1833_v0 }
  0x2e   : > { %322 = vmatprep.subr.mxu0 %v1743_v49  ;;  %392 = vmatpush1.msra.mxu1 %v1749_v50 }
  0x2f   : > { %323 = vmatpush1.msra.mxu0 %v1755_v51  ;;  %393 = vmatprep.subr.mxu1 %v1761_v52 }
  0x30   : > { %324 = vmatprep.subr.mxu0 %v1767_v53  ;;  %394 = vmatpush1.msra.mxu1 %v1773_v54 }
  0x31   : > { %325 = vmatpush1.msra.mxu0 %v1779_v55  ;;  %395 = vmatprep.subr.mxu1 %v1785_v56 }
  0x32   : > { %326 = vmatprep.subr.mxu0 %v1791_v57  ;;  %396 = vmatpush1.msra.mxu1 %v1797_v58  ;;  %v1840_v57 = vld [vmem:[%s2088_s1 + $0x10] sm:$0xff] }
  0x33   : > { %327 = vmatpush1.msra.mxu0 %v1803_v59  ;;  %397 = vmatprep.subr.mxu1 %v1809_v60  ;;  %2152 = vst [vmem:[#allocation23_spill] sm:$0xff] %v1840_v57  ;;  %v2153_v59 = vmov 0.0  }
  0x34   : > { %328 = vmatprep.subr.mxu0 %v1815_v61  ;;  %398 = vmatpush1.msra.mxu1 %v1821_v62 }
  0x35   : > { %329 = vmatpush1.msra.mxu0 %v1827_v63  ;;  %399 = vmatprep.subr.mxu1 %v1833_v0 }
  0x36   : > { %363 = vmatmul.mubr.f32.vlgmr.msra.gmra.mxu0 %v228_v6  ;;  %400 = vmatpush1.msra.mxu1 %v1840_v57 }
  0x37   : > { %433 = vmatprep.mubr.f32.mxu1 %v2153_v59  ;;  %532 = vmatprep.subr.mxu0 %v1465_v1 }
  0x38   : > { %434 = vmatmul.mubr.f32.vlgmr.msra.gmra.mxu1 %v228_v6  ;;  %603 = vmatprep.subr.mxu1 %v1486_v5  ;;  %v2154_v6 = vld [vmem:[#allocation15_spill] sm:$0xff] }
  0x39   : > { %533 = vmatpush1.msra.mxu0 %v1470_v2  ;;  %604 = vmatpush1.msra.mxu1 %v1499_v8 }
  0x3a   : > { %534 = vmatprep.subr.mxu0 %v1475_v3  ;;  %605 = vmatprep.subr.mxu1 %v1511_v10 }
  0x3b   : > { %535 = vmatpush1.msra.mxu0 %v1481_v4  ;;  %606 = vmatpush1.msra.mxu1 %v1516_v11 }
  0x3c   : > { %536 = vmatprep.subr.mxu0 %v1493_v7  ;;  %607 = vmatprep.subr.mxu1 %v1528_v13 }
  0x3d   : > { %537 = vmatpush1.msra.mxu0 %v1505_v9  ;;  %608 = vmatpush1.msra.mxu1 %v1540_v15 }
  0x3e   : > { %538 = vmatprep.subr.mxu0 %v1522_v12  ;;  %609 = vmatprep.subr.mxu1 %v1545_v16 }
  0x3f   : > { %539 = vmatpush1.msra.mxu0 %v1534_v14  ;;  %610 = vmatpush1.msra.mxu1 %v1557_v18 }
  0x40   : > { %540 = vmatprep.subr.mxu0 %v1551_v17  ;;  %611 = vmatprep.subr.mxu1 %v1569_v20 }
  0x41   : > { %541 = vmatpush1.msra.mxu0 %v1563_v19  ;;  %612 = vmatpush1.msra.mxu1 %v1581_v22 }
  0x42   : > { %542 = vmatprep.subr.mxu0 %v1575_v21  ;;  %613 = vmatprep.subr.mxu1 %v1593_v24 }
  0x43   : > { %543 = vmatpush1.msra.mxu0 %v1587_v23  ;;  %614 = vmatpush1.msra.mxu1 %v1605_v26 }
  0x44   : > { %544 = vmatprep.subr.mxu0 %v1599_v25  ;;  %615 = vmatprep.subr.mxu1 %v1617_v28 }
  0x45   : > { %545 = vmatpush1.msra.mxu0 %v1611_v27  ;;  %616 = vmatpush1.msra.mxu1 %v1629_v30 }
  0x46   : > { %546 = vmatprep.subr.mxu0 %v1623_v29  ;;  %617 = vmatprep.subr.mxu1 %v1641_v32 }
  0x47   : > { %547 = vmatpush1.msra.mxu0 %v1635_v31  ;;  %618 = vmatpush1.msra.mxu1 %v1653_v34 }
  0x48   : > { %548 = vmatprep.subr.mxu0 %v1647_v33  ;;  %619 = vmatprep.subr.mxu1 %v1665_v36 }
  0x49   : > { %549 = vmatpush1.msra.mxu0 %v1659_v35  ;;  %620 = vmatpush1.msra.mxu1 %v1677_v38 }
  0x4a   : > { %550 = vmatprep.subr.mxu0 %v1671_v37  ;;  %621 = vmatprep.subr.mxu1 %v1689_v40 }
  0x4b   : > { %551 = vmatpush1.msra.mxu0 %v1683_v39  ;;  %622 = vmatpush1.msra.mxu1 %v1701_v42 }
  0x4c   : > { %552 = vmatprep.subr.mxu0 %v1695_v41  ;;  %623 = vmatprep.subr.mxu1 %v1713_v44 }
  0x4d   : > { %553 = vmatpush1.msra.mxu0 %v1707_v43  ;;  %624 = vmatpush1.msra.mxu1 %v1725_v46 }
  0x4e   : > { %554 = vmatprep.subr.mxu0 %v1719_v45  ;;  %625 = vmatprep.subr.mxu1 %v1737_v48 }
  0x4f   : > { %555 = vmatpush1.msra.mxu0 %v1731_v47  ;;  %626 = vmatpush1.msra.mxu1 %v1749_v50  ;;  %v229_v47 = vld [vmem:[#allocation3] sm:$0xff] }
  0x50   : > { %556 = vmatprep.subr.mxu0 %v1743_v49  ;;  %627 = vmatprep.subr.mxu1 %v1761_v52  ;;  %v2155_v49 = vld [vmem:[#allocation17_spill] sm:$0xff] }
  0x51   : > { %557 = vmatpush1.msra.mxu0 %v1755_v51  ;;  %628 = vmatpush1.msra.mxu1 %v1773_v54 }
  0x52   : > { %558 = vmatprep.subr.mxu0 %v1767_v53  ;;  %629 = vmatprep.subr.mxu1 %v1785_v56 }
  0x53   : > { %559 = vmatpush1.msra.mxu0 %v1779_v55  ;;  %630 = vmatpush1.msra.mxu1 %v1797_v58 }
  0x54   : > { %560 = vmatprep.subr.mxu0 %v2154_v6  ;;  %631 = vmatprep.subr.mxu1 %v1809_v60 }
  0x55   : > { %561 = vmatpush1.msra.mxu0 %v2155_v49  ;;  %632 = vmatpush1.msra.mxu1 %v1821_v62  ;;  %v230_v49 = vld [vmem:[%s1454_s21] sm:$0xff]  ;;  %v231_v62 = vld [vmem:[%s1454_s21 + $0x8] sm:$0xff] }
  0x56   : > { %562 = vmatprep.subr.mxu0 %v1815_v61  ;;  %633 = vmatprep.subr.mxu1 %v1833_v0  ;;  %v233_v0 = vld [vmem:[%s1454_s21 + $0x18] sm:$0xff] }
  0x57   : > { %563 = vmatpush1.msra.mxu0 %v1827_v63  ;;  %596 = vmatprep.mubr.f32.mxu0 %v2153_v59 }
  0x58   : > { %634 = vmatpush1.msra.mxu1 %v1840_v57  ;;  %667 = vmatprep.mubr.f32.mxu1 %v2153_v59  ;;  %v232_v59 = vld [vmem:[%s1454_s21 + $0x10] sm:$0xff] }
  0x59   : > { %767 = vmatprep.subr.mxu0 %v1465_v1  ;;  %838 = vmatprep.subr.mxu1 %v1486_v5 }
  0xf6   : > { %v364_v60 = vpop.f32.mrf.mxu0 }
  0xf7   : > { %v440_v6 = vadd.f32 %v364_v60, %v230_v49 }
  0xf8   : > { %v366_v61 = vpop.f32.mrf.mxu0  ;;  %v435_v58 = vpop.f32.mrf.mxu1 }
  0xf9   : > { %v444_v55 = vmul.f32 0.5, %v440_v6  ;;  %v441_v63 = vadd.f32 %v366_v61, %v231_v62  ;;  %v442_v1 = vadd.f32 %v435_v58, %v232_v59  ;;  %v2162_v59 = vld [vmem:[#allocation11_spill] sm:$0xff] }
  0xfa   : > { %v437_v56 = vpop.f32.mrf.mxu1 }
  0xfb   : > { %1344 = vtanh.f32 %v444_v55  ;;  %v448_v53 = vmul.f32 0.5, %v441_v63  ;;  %v443_v57 = vadd.f32 %v437_v56, %v233_v0  ;;  %v452_v54 = vmul.f32 0.5, %v442_v1  ;;  %v2163_v63 = vld [vmem:[#allocation14_spill] sm:$0xff]  ;;  %v2164_v0 = vld [vmem:[#allocation13_spill] sm:$0xff] }
  0xfd   : > { %1346 = vtanh.f32 %v448_v53 }
  0xfe   : > { %1348 = vtanh.f32 %v443_v57 }
  0xff   : > { %1350 = vtanh.f32 %v452_v54  ;;  %v2161_v54 = vld [vmem:[#allocation12_spill] sm:$0xff] }
 0x108   : > { %v1345_v5 = vpop.eup %1344 }
 0x109   : > { %v446_v51 = vmul.f32 0.5, %v1345_v5  ;;  %v2156_v5 = vld [vmem:[#allocation6_spill] sm:$0xff] }
 0x10a   : > { %v1347_v52 = vpop.eup %1346 }
 0x10b   : > { %v447_v50 = vadd.f32 0.5, %v446_v51  ;;  %v450_v49 = vmul.f32 0.5, %v1347_v52  ;;  %v1349_v60 = vpop.eup %1348  ;;  %v2159_v51 = vld [vmem:[#allocation10_spill] sm:$0xff]  ;;  %v2160_v52 = vld [vmem:[#allocation9_spill] sm:$0xff] }
 0x10c   : > { %v1351_v53 = vpop.eup %1350 }
 0x10d   : > { %v451_v6 = vadd.f32 0.5, %v450_v49  ;;  %v458_v62 = vmul.f32 %v1349_v60, %v447_v50  ;;  %v454_v56 = vmul.f32 0.5, %v1351_v53  ;;  %v2158_v50 = vld [vmem:[#allocation7_spill] sm:$0xff]  ;;  %v2165_v49 = vld [vmem:[#allocation16_spill] sm:$0xff] }
 0x10e   : > { %v2166_v60 = vld [vmem:[#allocation15_spill] sm:$0xff] }
 0x10f   : > { %v457_v61 = vmul.f32 %v451_v6, %v229_v47  ;;  %v455_v57 = vadd.f32 0.5, %v454_v56  ;;  %v2157_v47 = vld [vmem:[#allocation8_spill] sm:$0xff]  ;;  %v2167_v6 = vld [vmem:[#allocation18_spill] sm:$0xff]  ;;  %v2170_v53 = vld [vmem:[#allocation19_spill] sm:$0xff] }
 0x110   : > { %v2171_v56 = vld [vmem:[#allocation22_spill] sm:$0xff] }
 0x111   : > { %v1920_v55 = vadd.f32 %v458_v62, %v457_v61  ;;  %v2168_v61 = vld [vmem:[#allocation17_spill] sm:$0xff]  ;;  %v2169_v62 = vld [vmem:[#allocation20_spill] sm:$0xff] }
 0x113   : > { %1352 = vtanh.f32 %v1920_v55 }
 0x120   : > { %v1353_v1 = vpop.eup %1352 }
 0x121   : > { %v461_v58 = vmul.f32 %v1353_v1, %v455_v57  ;;  %v2172_v57 = vld [vmem:[#allocation21_spill] sm:$0xff]  ;;  %v2173_v1 = vmov 0.0  }
 0x123   : > { %462 = vst [vmem:[%s1459_s24] sm:$0xff] %v461_v58  ;;  %597 = vmatmul.mubr.f32.vlgmr.msra.gmra.mxu0 %v461_v58  ;;  %668 = vmatmul.mubr.f32.vlgmr.msra.gmra.mxu1 %v461_v58  ;;  %v2174_v58 = vld [vmem:[#allocation23_spill] sm:$0xff] }
 0x124   : > { %768 = vmatpush1.msra.mxu0 %v1470_v2  ;;  %839 = vmatpush1.msra.mxu1 %v1499_v8 }
 0x125   : > { %769 = vmatprep.subr.mxu0 %v1475_v3  ;;  %840 = vmatprep.subr.mxu1 %v1511_v10 }
 0x126   : > { %770 = vmatpush1.msra.mxu0 %v1481_v4  ;;  %841 = vmatpush1.msra.mxu1 %v1516_v11 }
 0x127   : > { %771 = vmatprep.subr.mxu0 %v1493_v7  ;;  %842 = vmatprep.subr.mxu1 %v1528_v13 }
 0x128   : > { %772 = vmatpush1.msra.mxu0 %v1505_v9  ;;  %843 = vmatpush1.msra.mxu1 %v1540_v15 }
 0x129   : > { %773 = vmatprep.subr.mxu0 %v1522_v12  ;;  %844 = vmatprep.subr.mxu1 %v1545_v16 }
 0x12a   : > { %774 = vmatpush1.msra.mxu0 %v1534_v14  ;;  %845 = vmatpush1.msra.mxu1 %v1557_v18 }
 0x12b   : > { %775 = vmatprep.subr.mxu0 %v1551_v17  ;;  %846 = vmatprep.subr.mxu1 %v1569_v20 }
 0x12c   : > { %776 = vmatpush1.msra.mxu0 %v1563_v19  ;;  %847 = vmatpush1.msra.mxu1 %v1581_v22 }
 0x12d   : > { %777 = vmatprep.subr.mxu0 %v1575_v21  ;;  %848 = vmatprep.subr.mxu1 %v1593_v24 }
 0x12e   : > { %778 = vmatpush1.msra.mxu0 %v1587_v23  ;;  %849 = vmatpush1.msra.mxu1 %v1605_v26 }
 0x12f   : > { %779 = vmatprep.subr.mxu0 %v1599_v25  ;;  %850 = vmatprep.subr.mxu1 %v1617_v28 }
 0x130   : > { %780 = vmatpush1.msra.mxu0 %v1611_v27  ;;  %851 = vmatpush1.msra.mxu1 %v1629_v30 }
 0x131   : > { %781 = vmatprep.subr.mxu0 %v1623_v29  ;;  %852 = vmatprep.subr.mxu1 %v1641_v32 }
 0x132   : > { %782 = vmatpush1.msra.mxu0 %v1635_v31  ;;  %853 = vmatpush1.msra.mxu1 %v1653_v34 }
 0x133   : > { %783 = vmatprep.subr.mxu0 %v1647_v33  ;;  %854 = vmatprep.subr.mxu1 %v1665_v36 }
 0x134   : > { %784 = vmatpush1.msra.mxu0 %v1659_v35  ;;  %855 = vmatpush1.msra.mxu1 %v1677_v38 }
 0x135   : > { %785 = vmatprep.subr.mxu0 %v1671_v37  ;;  %856 = vmatprep.subr.mxu1 %v1689_v40 }
 0x136   : > { %786 = vmatpush1.msra.mxu0 %v1683_v39  ;;  %857 = vmatpush1.msra.mxu1 %v1701_v42 }
 0x137   : > { %787 = vmatprep.subr.mxu0 %v1695_v41  ;;  %858 = vmatprep.subr.mxu1 %v1713_v44 }
 0x138   : > { %788 = vmatpush1.msra.mxu0 %v1707_v43  ;;  %859 = vmatpush1.msra.mxu1 %v1725_v46 }
 0x139   : > { %789 = vmatprep.subr.mxu0 %v1719_v45  ;;  %860 = vmatprep.subr.mxu1 %v1737_v48 }
 0x13a   : > { %790 = vmatpush1.msra.mxu0 %v2156_v5  ;;  %861 = vmatpush1.msra.mxu1 %v2157_v47 }
 0x13b   : > { %791 = vmatprep.subr.mxu0 %v2158_v50  ;;  %862 = vmatprep.subr.mxu1 %v2159_v51 }
 0x13c   : > { %792 = vmatpush1.msra.mxu0 %v2160_v52  ;;  %863 = vmatpush1.msra.mxu1 %v2161_v54 }
 0x13d   : > { %793 = vmatprep.subr.mxu0 %v2162_v59  ;;  %864 = vmatprep.subr.mxu1 %v2163_v63 }
 0x13e   : > { %794 = vmatpush1.msra.mxu0 %v2164_v0  ;;  %865 = vmatpush1.msra.mxu1 %v2165_v49 }
 0x13f   : > { %795 = vmatprep.subr.mxu0 %v2166_v60  ;;  %866 = vmatprep.subr.mxu1 %v2167_v6  ;;  %v2175_v60 = vld [vmem:[#allocation4_spill] sm:$0xff]  ;;  %v2176_v6 = vld [vmem:[#allocation5_spill] sm:$0xff] }
 0x140   : > { %796 = vmatpush1.msra.mxu0 %v2168_v61  ;;  %867 = vmatpush1.msra.mxu1 %v2169_v62  ;;  %v1298_v61 = vld [vmem:[%s1454_s21 + $0x20] sm:$0xff] }
 0x141   : > { %797 = vmatprep.subr.mxu0 %v2170_v53  ;;  %868 = vmatprep.subr.mxu1 %v2171_v56  ;;  %v1299_v53 = vld [vmem:[%s1454_s21 + $0x28] sm:$0xff] }
 0x142   : > { %798 = vmatpush1.msra.mxu0 %v2172_v57  ;;  %831 = vmatprep.mubr.f32.mxu0 %v2173_v1  ;;  %v1301_v57 = vld [vmem:[%s1454_s21 + $0x38] sm:$0xff] }
 0x143   : > { %869 = vmatpush1.msra.mxu1 %v2174_v58  ;;  %902 = vmatprep.mubr.f32.mxu1 %v2173_v1  ;;  %v1300_v1 = vld [vmem:[%s1454_s21 + $0x30] sm:$0xff] }
 0x144   : > { %1002 = vmatprep.subr.mxu0 %v2175_v60  ;;  %1073 = vmatprep.subr.mxu1 %v2176_v6 }
 0x1e3   : > { %v598_v62 = vpop.f32.mrf.mxu0  ;;  %v669_v49 = vpop.f32.mrf.mxu1 }
 0x1e4   : > { %v674_v0 = vadd.f32 %v1298_v61, %v598_v62  ;;  %v676_v60 = vadd.f32 %v1300_v1, %v669_v49  ;;  %v1308_v1 = vld [vmem:[%s1454_s21 + $0x60] sm:$0xff] }
 0x1e5   : > { %v600_v63 = vpop.f32.mrf.mxu0  ;;  %v671_v54 = vpop.f32.mrf.mxu1 }
 0x1e6   : > { %v678_v56 = vmul.f32 0.5, %v674_v0  ;;  %v675_v59 = vadd.f32 %v1299_v53, %v600_v63  ;;  %v677_v58 = vadd.f32 %v1301_v57, %v671_v54  ;;  %v686_v51 = vmul.f32 0.5, %v676_v60 }
 0x1e8   : > { %1354 = vtanh.f32 %v678_v56  ;;  %v682_v52 = vmul.f32 0.5, %v675_v59 }
 0x1ea   : > { %1356 = vtanh.f32 %v682_v52 }
 0x1eb   : > { %1358 = vtanh.f32 %v677_v58 }
 0x1ec   : > { %1360 = vtanh.f32 %v686_v51 }
 0x1f5   : > { %v1355_v50 = vpop.eup %1354 }
 0x1f6   : > { %v680_v6 = vmul.f32 0.5, %v1355_v50 }
 0x1f7   : > { %v1357_v47 = vpop.eup %1356 }
 0x1f8   : > { %v681_v5 = vadd.f32 0.5, %v680_v6  ;;  %v684_v61 = vmul.f32 0.5, %v1357_v47  ;;  %v1359_v0 = vpop.eup %1358  ;;  %v1309_v6 = vld [vmem:[%s1454_s21 + $0x68] sm:$0xff] }
 0x1f9   : > { %v1361_v52 = vpop.eup %1360 }
 0x1fa   : > { %v685_v62 = vadd.f32 0.5, %v684_v61  ;;  %v692_v53 = vmul.f32 %v1359_v0, %v681_v5  ;;  %v688_v54 = vmul.f32 0.5, %v1361_v52 }
 0x1fc   : > { %v691_v63 = vmul.f32 %v685_v62, %v1920_v55  ;;  %v689_v59 = vadd.f32 0.5, %v688_v54 }
 0x1fe   : > { %v1995_v56 = vadd.f32 %v692_v53, %v691_v63  ;;  %v1311_v53 = vld [vmem:[%s1454_s21 + $0x78] sm:$0xff] }
 0x200   : > { %1362 = vtanh.f32 %v1995_v56 }
 0x20d   : > { %v1363_v49 = vpop.eup %1362 }
 0x20e   : > { %v695_v57 = vmul.f32 %v1363_v49, %v689_v59  ;;  %v1310_v59 = vld [vmem:[%s1454_s21 + $0x70] sm:$0xff] }
 0x210   : > { %1302 = vst [vmem:[%s1459_s24 + $0x8] sm:$0xff] %v695_v57  ;;  %832 = vmatmul.mubr.f32.vlgmr.msra.gmra.mxu0 %v695_v57  ;;  %903 = vmatmul.mubr.f32.vlgmr.msra.gmra.mxu1 %v695_v57 }
 0x211   : > { %1003 = vmatpush1.msra.mxu0 %v1470_v2  ;;  %1074 = vmatpush1.msra.mxu1 %v1499_v8  ;;  %v2177_v2 = vld [vmem:[#allocation6_spill] sm:$0xff]  ;;  %v2181_v8 = vld [vmem:[#allocation9_spill] sm:$0xff] }
 0x212   : > { %1004 = vmatprep.subr.mxu0 %v1475_v3  ;;  %1075 = vmatprep.subr.mxu1 %v1511_v10  ;;  %v2178_v3 = vld [vmem:[#allocation8_spill] sm:$0xff]  ;;  %v2183_v10 = vld [vmem:[#allocation11_spill] sm:$0xff] }
 0x213   : > { %1005 = vmatpush1.msra.mxu0 %v1481_v4  ;;  %1076 = vmatpush1.msra.mxu1 %v1516_v11  ;;  %v2179_v4 = vld [vmem:[#allocation7_spill] sm:$0xff]  ;;  %v2184_v11 = vld [vmem:[#allocation14_spill] sm:$0xff] }
 0x214   : > { %1006 = vmatprep.subr.mxu0 %v1493_v7  ;;  %1077 = vmatprep.subr.mxu1 %v1528_v13  ;;  %v2180_v7 = vld [vmem:[#allocation10_spill] sm:$0xff]  ;;  %v2186_v13 = vld [vmem:[#allocation16_spill] sm:$0xff] }
 0x215   : > { %1007 = vmatpush1.msra.mxu0 %v1505_v9  ;;  %1078 = vmatpush1.msra.mxu1 %v1540_v15  ;;  %v2182_v9 = vld [vmem:[#allocation12_spill] sm:$0xff]  ;;  %v2188_v15 = vld [vmem:[#allocation18_spill] sm:$0xff] }
 0x216   : > { %1008 = vmatprep.subr.mxu0 %v1522_v12  ;;  %1079 = vmatprep.subr.mxu1 %v1545_v16  ;;  %v2185_v12 = vld [vmem:[#allocation13_spill] sm:$0xff] }
 0x217   : > { %1009 = vmatpush1.msra.mxu0 %v1534_v14  ;;  %1080 = vmatpush1.msra.mxu1 %v1557_v18  ;;  %v2187_v14 = vld [vmem:[#allocation15_spill] sm:$0xff]  ;;  %v2189_v16 = vld [vmem:[#allocation17_spill] sm:$0xff] }
 0x218   : > { %1010 = vmatprep.subr.mxu0 %v1551_v17  ;;  %1081 = vmatprep.subr.mxu1 %v1569_v20  ;;  %v2190_v17 = vld [vmem:[#allocation20_spill] sm:$0xff]  ;;  %v2191_v18 = vld [vmem:[#allocation19_spill] sm:$0xff]  ;;  %v2193_v20 = vld [vmem:[#allocation21_spill] sm:$0xff] }
 0x219   : > { %1011 = vmatpush1.msra.mxu0 %v1563_v19  ;;  %1082 = vmatpush1.msra.mxu1 %v1581_v22  ;;  %v2192_v19 = vld [vmem:[#allocation22_spill] sm:$0xff]  ;;  %v2195_v22 = vld [vmem:[#allocation23_spill] sm:$0xff] }
 0x21a   : > { %1012 = vmatprep.subr.mxu0 %v1575_v21  ;;  %1083 = vmatprep.subr.mxu1 %v1593_v24  ;;  %v2194_v21 = vmov 0.0  }
 0x21b   : > { %1013 = vmatpush1.msra.mxu0 %v1587_v23  ;;  %1084 = vmatpush1.msra.mxu1 %v1605_v26  ;;  %v1303_v23 = vld [vmem:[%s1454_s21 + $0x40] sm:$0xff]  ;;  %v1304_v26 = vld [vmem:[%s1454_s21 + $0x48] sm:$0xff] }
 0x21c   : > { %1014 = vmatprep.subr.mxu0 %v1599_v25  ;;  %1085 = vmatprep.subr.mxu1 %v1617_v28 }
 0x21d   : > { %1015 = vmatpush1.msra.mxu0 %v1611_v27  ;;  %1086 = vmatpush1.msra.mxu1 %v1629_v30 }
 0x21e   : > { %1016 = vmatprep.subr.mxu0 %v1623_v29  ;;  %1087 = vmatprep.subr.mxu1 %v1641_v32 }
 0x21f   : > { %1017 = vmatpush1.msra.mxu0 %v1635_v31  ;;  %1088 = vmatpush1.msra.mxu1 %v1653_v34  ;;  %v1306_v31 = vld [vmem:[%s1454_s21 + $0x58] sm:$0xff] }
 0x220   : > { %1018 = vmatprep.subr.mxu0 %v1647_v33  ;;  %1089 = vmatprep.subr.mxu1 %v1665_v36 }
 0x221   : > { %1019 = vmatpush1.msra.mxu0 %v1659_v35  ;;  %1090 = vmatpush1.msra.mxu1 %v1677_v38  ;;  %v1305_v35 = vld [vmem:[%s1454_s21 + $0x50] sm:$0xff] }
 0x222   : > { %1020 = vmatprep.subr.mxu0 %v1671_v37  ;;  %1091 = vmatprep.subr.mxu1 %v1689_v40 }
 0x223   : > { %1021 = vmatpush1.msra.mxu0 %v1683_v39  ;;  %1092 = vmatpush1.msra.mxu1 %v1701_v42 }
 0x224   : > { %1022 = vmatprep.subr.mxu0 %v1695_v41  ;;  %1093 = vmatprep.subr.mxu1 %v1713_v44 }
 0x225   : > { %1023 = vmatpush1.msra.mxu0 %v1707_v43  ;;  %1094 = vmatpush1.msra.mxu1 %v1725_v46 }
 0x226   : > { %1024 = vmatprep.subr.mxu0 %v1719_v45  ;;  %1095 = vmatprep.subr.mxu1 %v1737_v48 }
 0x227   : > { %1025 = vmatpush1.msra.mxu0 %v2177_v2  ;;  %1096 = vmatpush1.msra.mxu1 %v2178_v3 }
 0x228   : > { %1026 = vmatprep.subr.mxu0 %v2179_v4  ;;  %1097 = vmatprep.subr.mxu1 %v2180_v7 }
 0x229   : > { %1027 = vmatpush1.msra.mxu0 %v2181_v8  ;;  %1098 = vmatpush1.msra.mxu1 %v2182_v9 }
 0x22a   : > { %1028 = vmatprep.subr.mxu0 %v2183_v10  ;;  %1099 = vmatprep.subr.mxu1 %v2184_v11 }
 0x22b   : > { %1029 = vmatpush1.msra.mxu0 %v2185_v12  ;;  %1100 = vmatpush1.msra.mxu1 %v2186_v13 }
 0x22c   : > { %1030 = vmatprep.subr.mxu0 %v2187_v14  ;;  %1101 = vmatprep.subr.mxu1 %v2188_v15 }
 0x22d   : > { %1031 = vmatpush1.msra.mxu0 %v2189_v16  ;;  %1102 = vmatpush1.msra.mxu1 %v2190_v17 }
 0x22e   : > { %1032 = vmatprep.subr.mxu0 %v2191_v18  ;;  %1103 = vmatprep.subr.mxu1 %v2192_v19 }
 0x22f   : > { %1033 = vmatpush1.msra.mxu0 %v2193_v20  ;;  %1066 = vmatprep.mubr.f32.mxu0 %v2194_v21 }
 0x230   : > { %1104 = vmatpush1.msra.mxu1 %v2195_v22  ;;  %1137 = vmatprep.mubr.f32.mxu1 %v2194_v21 }
 0x2d0   : > { %v833_v24 = vpop.f32.mrf.mxu0  ;;  %v904_v25 = vpop.f32.mrf.mxu1 }
 0x2d1   : > { %v909_v27 = vadd.f32 %v1303_v23, %v833_v24  ;;  %v911_v36 = vadd.f32 %v1305_v35, %v904_v25 }
 0x2d2   : > { %v835_v28 = vpop.f32.mrf.mxu0  ;;  %v906_v32 = vpop.f32.mrf.mxu1 }
 0x2d3   : > { %v913_v29 = vmul.f32 0.5, %v909_v27  ;;  %v910_v30 = vadd.f32 %v1304_v26, %v835_v28  ;;  %v912_v34 = vadd.f32 %v1306_v31, %v906_v32  ;;  %v921_v37 = vmul.f32 0.5, %v911_v36 }
 0x2d5   : > { %1364 = vtanh.f32 %v913_v29  ;;  %v917_v33 = vmul.f32 0.5, %v910_v30 }
 0x2d7   : > { %1366 = vtanh.f32 %v917_v33 }
 0x2d8   : > { %1368 = vtanh.f32 %v912_v34 }
 0x2d9   : > { %1370 = vtanh.f32 %v921_v37 }
 0x2e2   : > { %v1365_v38 = vpop.eup %1364 }
 0x2e3   : > { %v915_v39 = vmul.f32 0.5, %v1365_v38 }
 0x2e4   : > { %v1367_v40 = vpop.eup %1366 }
 0x2e5   : > { %v916_v41 = vadd.f32 0.5, %v915_v39  ;;  %v919_v42 = vmul.f32 0.5, %v1367_v40  ;;  %v1369_v44 = vpop.eup %1368 }
 0x2e6   : > { %v1371_v55 = vpop.eup %1370 }
 0x2e7   : > { %v920_v43 = vadd.f32 0.5, %v919_v42  ;;  %v927_v46 = vmul.f32 %v1369_v44, %v916_v41  ;;  %v923_v5 = vmul.f32 0.5, %v1371_v55 }
 0x2e9   : > { %v926_v45 = vmul.f32 %v920_v43, %v1995_v56  ;;  %v924_v47 = vadd.f32 0.5, %v923_v5 }
 0x2eb   : > { %v928_v48 = vadd.f32 %v927_v46, %v926_v45 }
 0x2ed   : > { %1372 = vtanh.f32 %v928_v48 }
 0x2fa   : > { %v1373_v50 = vpop.eup %1372 }
 0x2fb   : > { %v930_v51 = vmul.f32 %v1373_v50, %v924_v47 }
 0x2fd   : > { %1307 = vst [vmem:[%s1459_s24 + $0x10] sm:$0xff] %v930_v51  ;;  %1067 = vmatmul.mubr.f32.vlgmr.msra.gmra.mxu0 %v930_v51  ;;  %1138 = vmatmul.mubr.f32.vlgmr.msra.gmra.mxu1 %v930_v51 }
 0x3bd   : > { %v1068_v58 = vpop.f32.mrf.mxu0  ;;  %v1139_v60 = vpop.f32.mrf.mxu1 }
 0x3be   : > { %v1144_v61 = vadd.f32 %v1308_v1, %v1068_v58  ;;  %v1146_v49 = vadd.f32 %v1310_v59, %v1139_v60 }
 0x3bf   : > { %v1070_v62 = vpop.f32.mrf.mxu0  ;;  %v1141_v56 = vpop.f32.mrf.mxu1 }
 0x3c0   : > { %v1148_v0 = vmul.f32 0.5, %v1144_v61  ;;  %v1145_v63 = vadd.f32 %v1309_v6, %v1070_v62  ;;  %v1147_v54 = vadd.f32 %v1311_v53, %v1141_v56  ;;  %v1156_v57 = vmul.f32 0.5, %v1146_v49 }
 0x3c2   : > { %1374 = vtanh.f32 %v1148_v0  ;;  %v1152_v52 = vmul.f32 0.5, %v1145_v63 }
 0x3c4   : > { %1376 = vtanh.f32 %v1152_v52 }
 0x3c5   : > { %1378 = vtanh.f32 %v1147_v54 }
 0x3c6   : > { %1380 = vtanh.f32 %v1156_v57 }
 0x3cf   : > { %v1375_v2 = vpop.eup %1374 }
 0x3d0   : > { %v1150_v3 = vmul.f32 0.5, %v1375_v2 }
 0x3d1   : > { %v1377_v4 = vpop.eup %1376 }
 0x3d2   : > { %v1151_v7 = vadd.f32 0.5, %v1150_v3  ;;  %v1154_v8 = vmul.f32 0.5, %v1377_v4  ;;  %v1379_v10 = vpop.eup %1378 }
 0x3d3   : > { %v1381_v14 = vpop.eup %1380 }
 0x3d4   : > { %v1155_v9 = vadd.f32 0.5, %v1154_v8  ;;  %v1162_v12 = vmul.f32 %v1379_v10, %v1151_v7  ;;  %v1158_v15 = vmul.f32 0.5, %v1381_v14 }
 0x3d6   : > { %v1161_v11 = vmul.f32 %v1155_v9, %v928_v48  ;;  %v1159_v16 = vadd.f32 0.5, %v1158_v15 }
 0x3d8   : > { %v1163_v13 = vadd.f32 %v1162_v12, %v1161_v11 }
 0x3da   : > { %1382 = vtanh.f32 %v1163_v13  ;;  %1169 = vst [vmem:[#allocation3] sm:$0xff] %v1163_v13 }
 0x3e6   : > { %1173 = sbr.rel (%p1313_p6) target bundleno = 1004 (0x3ec), region = 36 }
 0x3e7   : > { %v1383_v17 = vpop.eup %1382 }
 0x3e8   : > { %v1165_v18 = vmul.f32 %v1383_v17, %v1159_v16 }
 0x3ea   : > { %1312 = vst [vmem:[%s1459_s24 + $0x18] sm:$0xff] %v1165_v18  ;;  %1168 = vst [vmem:[#allocation2] sm:$0xff] %v1165_v18 }
 0x3eb   : > { %1174 = vst [vmem:[%s2090_s3] sm:$0xff] %v1163_v13 }
 0x3ec PF: > { %s14_s14 = sadd.s32 1, %s1406_s14   ;;  %s2196_s12 = smov %s1402_s13 }
 0x3ed   : > { %p11_p7 = scmp.ge.s32.totalorder %s14_s14, 4   ;;  %s2197_s13 = smov %s2199_s15 }
 0x3ef   :  { %13 = sbr.rel (!%p11_p7) target bundleno = 2 (0x2), region = 84 }

</bundles_post_ra>
